<compile_context>
chip_gen: v5e
topology: v5e:2x2
jax: 0.10.0
libtpu: 0.0.40
codegen_flags: <defaults>
</compile_context>

<pallas_src>
import jax
import jax.numpy as jnp
from jax.experimental import pallas as pl
from jax.experimental.pallas import tpu as pltpu


def _flatten_copy_kernel(x_ref, o_ref):
    # Pure data movement: copy the current (TILE_N, TILE_F) VMEM tile.
    o_ref[...] = x_ref[...]


def _sublane_align(dtype) -> int:
    # Sublane packing: 8 rows for 4-byte dtypes, 16 for 2-byte, 32 for 1-byte.
    itemsize = jnp.dtype(dtype).itemsize
    return {4: 8, 2: 16, 1: 32}.get(itemsize, 8)


def _pick_tile(dim: int, align: int, max_tile: int) -> int:
    """Largest multiple of `align` that divides `dim` and is <= max_tile.

    Falls back to the full extent when `dim` is not align-divisible; a
    full-extent block always satisfies the (8, 128) tiling rule.
    """
    if dim == 0 or dim % align != 0:
        return dim
    t = min(max_tile, dim)
    t = max(align, (t // align) * align)
    while dim % t != 0:
        t -= align
    return t


# ~2 MiB per block -> <= 8 MiB resident with double-buffered in + out,
# safe on every generation (v5e 16 MiB scoped default, v7x 64 MiB physical).
_BLOCK_BYTES_TARGET = 2 * 1024 * 1024


@jax.jit
def flatten(x: jax.Array) -> jax.Array:
    """Equivalent of PyTorch Flatten().forward(x) for an NCHW (or any) input."""
    n = x.shape[0]
    flat = 1
    for d in x.shape[1:]:
        flat *= d
    itemsize = jnp.dtype(x.dtype).itemsize

    # Glue: metadata-only reshape to a lane-dense (N, C*H*W) 2D slab.
    # Element ordering of a row-major reshape matches torch .view(N, -1).
    x2d = jnp.reshape(x, (n, flat))

    # Tile selection: lane dim a multiple of 128 (unmasked vst), sublane dim a
    # multiple of the dtype packing factor; fall back to full extents when the
    # array dims are not divisible (still satisfies the (8, 128) rule).
    sub = _sublane_align(x.dtype)
    tile_n = _pick_tile(n, sub, 256)
    elems_budget = max(128, _BLOCK_BYTES_TARGET // (itemsize * max(tile_n, 1)))
    tile_f = _pick_tile(flat, 128, elems_budget)

    grid = (n // tile_n, flat // tile_f)
    block_bytes = tile_n * tile_f * itemsize

    return pl.pallas_call(
        _flatten_copy_kernel,
        out_shape=jax.ShapeDtypeStruct((n, flat), x.dtype),
        grid=grid,
        in_specs=[pl.BlockSpec((tile_n, tile_f), lambda i, j: (i, j))],
        out_specs=pl.BlockSpec((tile_n, tile_f), lambda i, j: (i, j)),
        # Output aliases the input buffer: no second HBM allocation.
        input_output_aliases={0: 0},
        compiler_params=pltpu.CompilerParams(
            dimension_semantics=("parallel", "parallel"),
            vmem_limit_bytes=max(4 * block_bytes + (4 << 20), 16 << 20),
        ),
        cost_estimate=pl.CostEstimate(
            flops=0,
            transcendentals=0,
            bytes_accessed=2 * n * flat * itemsize,
        ),
    )(x2d)


if __name__ == "__main__":
    key = jax.random.PRNGKey(0)
    # Small NCHW feature map: N=2, C=4, H=W=16.
    x = jax.random.normal(key, (2, 4, 16, 16), dtype=jnp.float32)

    y = jax.block_until_ready(flatten(x))

    # Reference: plain JAX reshape (same semantics as torch .view(N, -1)).
    ref = jnp.reshape(x, (x.shape[0], -1))
    assert y.shape == (2, 4 * 16 * 16)
    assert y.dtype == x.dtype
    assert bool(jnp.all(y == ref))

    print("KERNEL_OK")
</pallas_src>

<mosaic_0001>
module attributes {stable_mosaic.version = 11 : i64} {
  func.func @_flatten_copy_kernel(%arg0: i32, %arg1: i32, %arg2: memref<2x1024xf32, #tpu.memory_space<vmem>>, %arg3: memref<2x1024xf32, #tpu.memory_space<vmem>>) attributes {dimension_semantics = [#tpu.dimension_semantics<parallel>, #tpu.dimension_semantics<parallel>], iteration_bounds = array<i64: 1, 1>, scalar_prefetch = 0 : i64, scratch_operands = 0 : i64, tpu.core_type = #tpu.core_type<tc>, window_params = [{transform_indices = @transform_0, window_bounds = array<i64: 2, 1024>}, {transform_indices = @transform_1, window_bounds = array<i64: 2, 1024>}]} {
    %c0 = arith.constant 0 : index
    %c0_0 = arith.constant 0 : index
    %0 = vector.load %arg2[%c0, %c0_0] : memref<2x1024xf32, #tpu.memory_space<vmem>>, vector<2x1024xf32>
    %c0_1 = arith.constant 0 : index
    %c0_2 = arith.constant 0 : index
    %1 = vector.load %arg3[%c0_1, %c0_2] : memref<2x1024xf32, #tpu.memory_space<vmem>>, vector<2x1024xf32>
    tpu.vector_store %arg3[%c0_1, %c0_2], %0 {strides = array<i32>} : memref<2x1024xf32, #tpu.memory_space<vmem>>, vector<2x1024xf32>,
    return
  }
  func.func @transform_0(%arg0: i32, %arg1: i32) -> (i32, i32) {
    %c0_i32 = arith.constant 0 : i32
    return %arg0, %arg1 : i32, i32
  }
  func.func @transform_1(%arg0: i32, %arg1: i32) -> (i32, i32) {
    %c0_i32 = arith.constant 0 : i32
    return %arg0, %arg1 : i32, i32
  }
}

</mosaic_0001>

<bundles_post_ra>
// kernel: flatten.1
= control target key start
LH: loop header
LB: loop body
LE: loop exit
PB: predicated region body
PF: predicated region fallthrough
CT: control target
= control target key end

     0   :  { %6 = vsyncpa [#allocation3], 0  ;;  %s116_s0 = inlined_call_operand.hbm [shape: f32[2,1024], index: 0, kind: input, shape index: {}, may-alias: {0,1}]   ;;  %s117_s1 = inlined_call_operand.hbm [shape: f32[2,1024], index: 1, kind: output, shape index: {}, may-alias: {0,1}]  }
   0x1   :  { %7 = vsyncpa [#allocation4], 0  ;;  %s13_s8 = sshll.u32 %s116_s0, 4  ;;  %s98_s9 = smov [#allocation2]   ;;  %s14_s8 = int_to_ptr.hbm [resolvable:$true] %s13_s8 }
   0x2   :  { %s15_s10 = sshll.u32 %s98_s9, 4  ;;  %s16_s10 = int_to_ptr.vmem [resolvable:$true] %s15_s10 }
   0x3   :  { %18 = dma.hbm_to_vmem [thread:$0]  %s14_s8, 256, %s16_s10, [#allocation3]  }
   0x4   :  { %94 = dma.done.wait [#allocation3], 256  }
   0x5   :  { %95 = vsyncadd [#allocation3], 4294967040  ;;  %s99_s11 = smov [#allocation5]   ;;  %s34_s15 = sshll.u32 %s117_s1, 4  ;;  %v23_v0 = vld [vmem:[#allocation2] sm:$0xff]  ;;  %v24_v1 = vld [vmem:[#allocation2 + $0x8] sm:$0xff]  ;;  %s35_s15 = int_to_ptr.hbm [resolvable:$true] %s34_s15 }
   0x6   :  { %s32_s12 = sshll.u32 %s99_s11, 4  ;;  %25 = vst [vmem:[#allocation5] sm:$0xff] %v23_v0  ;;  %s33_s12 = int_to_ptr.vmem [resolvable:$true] %s32_s12 }
   0x7   :  { %26 = vst [vmem:[#allocation5 + $0x8] sm:$0xff] %v24_v1 }
   0x8   :  { %37 = dma.vmem_to_hbm [thread:$0]  %s33_s12, 256, %s35_s15, [#allocation4]  }
   0x9   :  { %96 = dma.done.wait [#allocation4], 256  }
   0xa   :  { %97 = vsyncadd [#allocation4], 4294967040 }
   0xb   :  { %42 = vsyncpa [#allocation3], 1 }
   0xc   :  { %43 = vsyncpa [#allocation4], 1 }

</bundles_post_ra>
